<compile_context>
chip_gen: v7x
topology: tpu7x:2x2x1
jax: 0.10.0
libtpu: 0.0.40
codegen_flags: <defaults>
</compile_context>

<pallas_src>
import random

import jax
import jax.numpy as jnp
from jax.experimental import pallas as pl
from jax.experimental.pallas import tpu as pltpu


def _cas_to_asc_kernel(x_ref, o_ref):
    # x_ref: (C, TM) lane-dense input tile; o_ref: (TM, C) output tile.
    # 2-D transpose lowers to the XLU (vxpose); compute is never the bottleneck.
    o_ref[...] = x_ref[...].T


def _pick_tile(m):
    # Largest 128-multiple tile that divides m; fall back to the full extent
    # (allowed by the BlockSpec full-dim exception) for small/odd sizes.
    for t in (1024, 512, 256, 128):
        if m % t == 0:
            return t
    return m


def tensor_to_numpy_forward(x, p=1.0, rng=None):
    """With probability `p`, rearrange x: 'c a s -> a s c'. Otherwise return x.

    Matches TensorToNumpy.forward. The coin flip mirrors `torch.rand(1) <= p`
    using host-side Python randomness (jit-safe: it is resolved before any
    traced computation; p >= 1.0 always applies the transform).
    """
    if p < 1.0:
        coin = (rng.random() if rng is not None else random.random())
        if coin > p:
            return x

    c, a, s = x.shape
    m = a * s
    x2d = x.reshape(c, m)          # free row-major reshape
    tm = _pick_tile(m)

    out2d = pl.pallas_call(
        _cas_to_asc_kernel,
        out_shape=jax.ShapeDtypeStruct((m, c), x.dtype),
        grid_spec=pltpu.PrefetchScalarGridSpec(
            num_scalar_prefetch=0,
            grid=(m // tm,),
            in_specs=[pl.BlockSpec((c, tm), lambda j: (0, j))],
            out_specs=pl.BlockSpec((tm, c), lambda j: (j, 0)),
        ),
        compiler_params=pltpu.CompilerParams(
            dimension_semantics=("parallel",),
        ),
    )(x2d)

    # TODO(synk): torch's `.numpy()` host conversion has no Pallas equivalent;
    # we return a JAX device array with the rearranged layout instead.
    return out2d.reshape(a, s, c)  # free row-major reshape


if __name__ == "__main__":
    key = jax.random.PRNGKey(0)
    # Shapes implied by the forward's 'c a s' pattern: channels=4, a=32, s=16.
    C, A, S = 4, 32, 16
    x = jax.random.uniform(key, (C, A, S), dtype=jnp.float32)

    y = tensor_to_numpy_forward(x, p=1.0)
    y = jax.block_until_ready(y)

    # Reference check against plain JAX rearrange.
    y_ref = jnp.transpose(x, (1, 2, 0))
    assert y.shape == (A, S, C) and y.dtype == x.dtype
    assert jnp.array_equal(y, y_ref), "mismatch vs reference rearrange"

    print("KERNEL_OK")
</pallas_src>

<mosaic_0001>
module attributes {stable_mosaic.version = 11 : i64} {
  func.func @_cas_to_asc_kernel(%arg0: i32, %arg1: memref<4x512xf32, #tpu.memory_space<vmem>>, %arg2: memref<512x4xf32, #tpu.memory_space<vmem>>) attributes {dimension_semantics = [#tpu.dimension_semantics<parallel>], iteration_bounds = array<i64: 1>, scalar_prefetch = 0 : i64, scratch_operands = 0 : i64, tpu.core_type = #tpu.core_type<tc>, window_params = [{transform_indices = @transform_0, window_bounds = array<i64: 4, 512>}, {transform_indices = @transform_1, window_bounds = array<i64: 512, 4>}]} {
    %c0 = arith.constant 0 : index
    %c0_0 = arith.constant 0 : index
    %0 = vector.load %arg1[%c0, %c0_0] : memref<4x512xf32, #tpu.memory_space<vmem>>, vector<4x512xf32>
    %1 = tpu.transpose %0, [1, 0] : vector<4x512xf32> -> vector<512x4xf32>
    %c0_1 = arith.constant 0 : index
    %c0_2 = arith.constant 0 : index
    %2 = vector.load %arg2[%c0_1, %c0_2] : memref<512x4xf32, #tpu.memory_space<vmem>>, vector<512x4xf32>
    tpu.vector_store %arg2[%c0_1, %c0_2], %1 {strides = array<i32>} : memref<512x4xf32, #tpu.memory_space<vmem>>, vector<512x4xf32>,
    return
  }
  func.func @transform_0(%arg0: i32) -> (i32, i32) {
    %c0_i32 = arith.constant 0 : i32
    %c0_i32_0 = arith.constant 0 : i32
    return %c0_i32, %arg0 : i32, i32
  }
  func.func @transform_1(%arg0: i32) -> (i32, i32) {
    %c0_i32 = arith.constant 0 : i32
    %c0_i32_0 = arith.constant 0 : i32
    return %arg0, %c0_i32 : i32, i32
  }
}

</mosaic_0001>

<bundles_post_ra>
// kernel: tpu_custom_call.1
= control target key start
LH: loop header
LB: loop body
LE: loop exit
PB: predicated region body
PF: predicated region fallthrough
CT: control target
= control target key end

     0   :  { %6 = vsyncpa [#allocation3], 0  ;;  %s254_s6 = smov [#allocation2]   ;;  %s533_s0 = inlined_call_operand.hbm [shape: f32[4,512], index: 0, kind: input, shape index: {}]   ;;  %s534_s1 = inlined_call_operand.vmem [shape: f32[512,4], index: 1, kind: output, shape index: {}]  }
   0x1   :  { %s13_s7 = sshll.u32 %s254_s6, 4  ;;  %s230_s10 = scalar_lea.hbm %s533_s0, 256  ;;  %s14_s7 = int_to_ptr.vmem [resolvable:$true] %s13_s7 }
   0x2   :  { %p231_p0 = scmp.ne.s32.totalorder %s533_s0, %s230_s10  ;;  %p234_p1 = scmp.lt.u32.totalorder %s230_s10, %s533_s0 }
   0x4   :  { %p236_p2 = pnand %p234_p1, %p231_p0 }
   0x6   :  { %239 = shalt.err (!%p236_p2)
}
   0x7   :  { %s240_s15 = scalar_lea.vmem %s14_s7, 256  ;;  %p245_p4 = scmp.lt.s32.totalorder %s14_s7, %s14_s7 }
   0x8   :  { %p241_p3 = scmp.ne.s32.totalorder %s14_s7, %s240_s15  ;;  %p246_p5 = scmp.lt.s32.totalorder %s240_s15, %s240_s15 }
   0xa   :  { %p247_p6 = por %p246_p5, %p245_p4 }
   0xc   :  { %p248_p7 = pnand %p247_p6, %p241_p3 }
   0xe   :  { %251 = shalt.err (!%p248_p7)
}
   0xf   :  { %16 = dma.hbm_to_vmem [thread:$0]  %s533_s0, 256, %s14_s7, [#allocation3]  }
  0x10   :  { %252 = dma.done.wait [#allocation3], 256  }
  0x11   :  { %253 = vsyncadd [#allocation3], 4294967040  ;;  %v21_v0 = vld [vmem:[#allocation2 + $0x8] sm:$0xff]  ;;  %v20_v1 = vld [vmem:[#allocation2] sm:$0xff]  ;;  %vm156_vm0 = vcmask 31744  }
  0x12   :  { %92 = vxpose.xlu1.b32.start.end [1/1] (short) %v21_v0, 128  ;;  %28 = vxpose.xlu0.b32.start.end [1/1] (short) %v20_v1, 128  ;;  %v25_v2 = vcombine.high %v21_v0, %v21_v0  ;;  %v24_v3 = vcombine.high %v20_v1, %v20_v1 }
  0x4f   :  { %124 = vxpose.xlu1.b32.start.end [1/1] (short) %v25_v2, 128  ;;  %60 = vxpose.xlu0.b32.start.end [1/1] (short) %v24_v3, 128 }
  0x92   :  { %v108_v4 = vpop.trf.xlu1  ;;  %v44_v5 = vpop.trf.xlu0 }
  0x93   :  { %189 = vst.msk [vmem:[%s534_s1 + $0x100] sm:$0xff] %vm156_vm0, %v108_v4  ;;  %157 = vst.msk [vmem:[%s534_s1] sm:$0xff] %vm156_vm0, %v44_v5 }
  0x96   :  { %v109_v6 = vpop.trf.xlu1  ;;  %v45_v7 = vpop.trf.xlu0 }
  0x97   :  { %190 = vst.msk [vmem:[%s534_s1 + $0x108] sm:$0xff] %vm156_vm0, %v109_v6  ;;  %158 = vst.msk [vmem:[%s534_s1 + $0x8] sm:$0xff] %vm156_vm0, %v45_v7 }
  0x9a   :  { %v110_v8 = vpop.trf.xlu1  ;;  %v46_v9 = vpop.trf.xlu0 }
  0x9b   :  { %191 = vst.msk [vmem:[%s534_s1 + $0x110] sm:$0xff] %vm156_vm0, %v110_v8  ;;  %159 = vst.msk [vmem:[%s534_s1 + $0x10] sm:$0xff] %vm156_vm0, %v46_v9 }
  0x9e   :  { %v111_v10 = vpop.trf.xlu1  ;;  %v47_v11 = vpop.trf.xlu0 }
  0x9f   :  { %192 = vst.msk [vmem:[%s534_s1 + $0x118] sm:$0xff] %vm156_vm0, %v111_v10  ;;  %160 = vst.msk [vmem:[%s534_s1 + $0x18] sm:$0xff] %vm156_vm0, %v47_v11 }
  0xa2   :  { %v112_v12 = vpop.trf.xlu1  ;;  %v48_v13 = vpop.trf.xlu0 }
  0xa3   :  { %193 = vst.msk [vmem:[%s534_s1 + $0x120] sm:$0xff] %vm156_vm0, %v112_v12  ;;  %161 = vst.msk [vmem:[%s534_s1 + $0x20] sm:$0xff] %vm156_vm0, %v48_v13 }
  0xa6   :  { %v113_v14 = vpop.trf.xlu1  ;;  %v49_v15 = vpop.trf.xlu0 }
  0xa7   :  { %194 = vst.msk [vmem:[%s534_s1 + $0x128] sm:$0xff] %vm156_vm0, %v113_v14  ;;  %162 = vst.msk [vmem:[%s534_s1 + $0x28] sm:$0xff] %vm156_vm0, %v49_v15 }
  0xaa   :  { %v114_v16 = vpop.trf.xlu1  ;;  %v50_v17 = vpop.trf.xlu0 }
  0xab   :  { %195 = vst.msk [vmem:[%s534_s1 + $0x130] sm:$0xff] %vm156_vm0, %v114_v16  ;;  %163 = vst.msk [vmem:[%s534_s1 + $0x30] sm:$0xff] %vm156_vm0, %v50_v17 }
  0xae   :  { %v115_v18 = vpop.trf.xlu1  ;;  %v51_v19 = vpop.trf.xlu0 }
  0xaf   :  { %196 = vst.msk [vmem:[%s534_s1 + $0x138] sm:$0xff] %vm156_vm0, %v115_v18  ;;  %164 = vst.msk [vmem:[%s534_s1 + $0x38] sm:$0xff] %vm156_vm0, %v51_v19 }
  0xb2   :  { %v116_v20 = vpop.trf.xlu1  ;;  %v52_v21 = vpop.trf.xlu0 }
  0xb3   :  { %197 = vst.msk [vmem:[%s534_s1 + $0x140] sm:$0xff] %vm156_vm0, %v116_v20  ;;  %165 = vst.msk [vmem:[%s534_s1 + $0x40] sm:$0xff] %vm156_vm0, %v52_v21 }
  0xb6   :  { %v117_v22 = vpop.trf.xlu1  ;;  %v53_v23 = vpop.trf.xlu0 }
  0xb7   :  { %198 = vst.msk [vmem:[%s534_s1 + $0x148] sm:$0xff] %vm156_vm0, %v117_v22  ;;  %166 = vst.msk [vmem:[%s534_s1 + $0x48] sm:$0xff] %vm156_vm0, %v53_v23 }
  0xba   :  { %v118_v24 = vpop.trf.xlu1  ;;  %v54_v25 = vpop.trf.xlu0 }
  0xbb   :  { %199 = vst.msk [vmem:[%s534_s1 + $0x150] sm:$0xff] %vm156_vm0, %v118_v24  ;;  %167 = vst.msk [vmem:[%s534_s1 + $0x50] sm:$0xff] %vm156_vm0, %v54_v25 }
  0xbe   :  { %v119_v26 = vpop.trf.xlu1  ;;  %v55_v27 = vpop.trf.xlu0 }
  0xbf   :  { %200 = vst.msk [vmem:[%s534_s1 + $0x158] sm:$0xff] %vm156_vm0, %v119_v26  ;;  %168 = vst.msk [vmem:[%s534_s1 + $0x58] sm:$0xff] %vm156_vm0, %v55_v27 }
  0xc2   :  { %v120_v28 = vpop.trf.xlu1  ;;  %v56_v29 = vpop.trf.xlu0 }
  0xc3   :  { %201 = vst.msk [vmem:[%s534_s1 + $0x160] sm:$0xff] %vm156_vm0, %v120_v28  ;;  %169 = vst.msk [vmem:[%s534_s1 + $0x60] sm:$0xff] %vm156_vm0, %v56_v29 }
  0xc6   :  { %v121_v30 = vpop.trf.xlu1  ;;  %v57_v31 = vpop.trf.xlu0 }
  0xc7   :  { %202 = vst.msk [vmem:[%s534_s1 + $0x168] sm:$0xff] %vm156_vm0, %v121_v30  ;;  %170 = vst.msk [vmem:[%s534_s1 + $0x68] sm:$0xff] %vm156_vm0, %v57_v31 }
  0xca   :  { %v122_v32 = vpop.trf.xlu1  ;;  %v58_v33 = vpop.trf.xlu0 }
  0xcb   :  { %203 = vst.msk [vmem:[%s534_s1 + $0x170] sm:$0xff] %vm156_vm0, %v122_v32  ;;  %171 = vst.msk [vmem:[%s534_s1 + $0x70] sm:$0xff] %vm156_vm0, %v58_v33 }
  0xce   :  { %v123_v34 = vpop.trf.xlu1  ;;  %v59_v35 = vpop.trf.xlu0 }
  0xcf   :  { %204 = vst.msk [vmem:[%s534_s1 + $0x178] sm:$0xff] %vm156_vm0, %v123_v34  ;;  %172 = vst.msk [vmem:[%s534_s1 + $0x78] sm:$0xff] %vm156_vm0, %v59_v35 }
  0xd2   :  { %v140_v36 = vpop.trf.xlu1  ;;  %v76_v37 = vpop.trf.xlu0 }
  0xd3   :  { %205 = vst.msk [vmem:[%s534_s1 + $0x180] sm:$0xff] %vm156_vm0, %v140_v36  ;;  %173 = vst.msk [vmem:[%s534_s1 + $0x80] sm:$0xff] %vm156_vm0, %v76_v37 }
  0xd6   :  { %v141_v38 = vpop.trf.xlu1  ;;  %v77_v39 = vpop.trf.xlu0 }
  0xd7   :  { %206 = vst.msk [vmem:[%s534_s1 + $0x188] sm:$0xff] %vm156_vm0, %v141_v38  ;;  %174 = vst.msk [vmem:[%s534_s1 + $0x88] sm:$0xff] %vm156_vm0, %v77_v39 }
  0xda   :  { %v142_v40 = vpop.trf.xlu1  ;;  %v78_v41 = vpop.trf.xlu0 }
  0xdb   :  { %207 = vst.msk [vmem:[%s534_s1 + $0x190] sm:$0xff] %vm156_vm0, %v142_v40  ;;  %175 = vst.msk [vmem:[%s534_s1 + $0x90] sm:$0xff] %vm156_vm0, %v78_v41 }
  0xde   :  { %v143_v42 = vpop.trf.xlu1  ;;  %v79_v43 = vpop.trf.xlu0 }
  0xdf   :  { %208 = vst.msk [vmem:[%s534_s1 + $0x198] sm:$0xff] %vm156_vm0, %v143_v42  ;;  %176 = vst.msk [vmem:[%s534_s1 + $0x98] sm:$0xff] %vm156_vm0, %v79_v43 }
  0xe2   :  { %v144_v44 = vpop.trf.xlu1  ;;  %v80_v45 = vpop.trf.xlu0 }
  0xe3   :  { %209 = vst.msk [vmem:[%s534_s1 + $0x1a0] sm:$0xff] %vm156_vm0, %v144_v44  ;;  %177 = vst.msk [vmem:[%s534_s1 + $0xa0] sm:$0xff] %vm156_vm0, %v80_v45 }
  0xe6   :  { %v145_v46 = vpop.trf.xlu1  ;;  %v81_v47 = vpop.trf.xlu0 }
  0xe7   :  { %210 = vst.msk [vmem:[%s534_s1 + $0x1a8] sm:$0xff] %vm156_vm0, %v145_v46  ;;  %178 = vst.msk [vmem:[%s534_s1 + $0xa8] sm:$0xff] %vm156_vm0, %v81_v47 }
  0xea   :  { %v146_v48 = vpop.trf.xlu1  ;;  %v82_v49 = vpop.trf.xlu0 }
  0xeb   :  { %211 = vst.msk [vmem:[%s534_s1 + $0x1b0] sm:$0xff] %vm156_vm0, %v146_v48  ;;  %179 = vst.msk [vmem:[%s534_s1 + $0xb0] sm:$0xff] %vm156_vm0, %v82_v49 }
  0xee   :  { %v147_v50 = vpop.trf.xlu1  ;;  %v83_v51 = vpop.trf.xlu0 }
  0xef   :  { %212 = vst.msk [vmem:[%s534_s1 + $0x1b8] sm:$0xff] %vm156_vm0, %v147_v50  ;;  %180 = vst.msk [vmem:[%s534_s1 + $0xb8] sm:$0xff] %vm156_vm0, %v83_v51 }
  0xf2   :  { %v148_v52 = vpop.trf.xlu1  ;;  %v84_v53 = vpop.trf.xlu0 }
  0xf3   :  { %213 = vst.msk [vmem:[%s534_s1 + $0x1c0] sm:$0xff] %vm156_vm0, %v148_v52  ;;  %181 = vst.msk [vmem:[%s534_s1 + $0xc0] sm:$0xff] %vm156_vm0, %v84_v53 }
  0xf6   :  { %v149_v54 = vpop.trf.xlu1  ;;  %v85_v55 = vpop.trf.xlu0 }
  0xf7   :  { %214 = vst.msk [vmem:[%s534_s1 + $0x1c8] sm:$0xff] %vm156_vm0, %v149_v54  ;;  %182 = vst.msk [vmem:[%s534_s1 + $0xc8] sm:$0xff] %vm156_vm0, %v85_v55 }
  0xfa   :  { %v150_v56 = vpop.trf.xlu1  ;;  %v86_v57 = vpop.trf.xlu0 }
  0xfb   :  { %215 = vst.msk [vmem:[%s534_s1 + $0x1d0] sm:$0xff] %vm156_vm0, %v150_v56  ;;  %183 = vst.msk [vmem:[%s534_s1 + $0xd0] sm:$0xff] %vm156_vm0, %v86_v57 }
  0xfe   :  { %v151_v58 = vpop.trf.xlu1  ;;  %v87_v59 = vpop.trf.xlu0 }
  0xff   :  { %216 = vst.msk [vmem:[%s534_s1 + $0x1d8] sm:$0xff] %vm156_vm0, %v151_v58  ;;  %184 = vst.msk [vmem:[%s534_s1 + $0xd8] sm:$0xff] %vm156_vm0, %v87_v59 }
 0x102   :  { %v152_v60 = vpop.trf.xlu1  ;;  %v88_v61 = vpop.trf.xlu0 }
 0x103   :  { %217 = vst.msk [vmem:[%s534_s1 + $0x1e0] sm:$0xff] %vm156_vm0, %v152_v60  ;;  %185 = vst.msk [vmem:[%s534_s1 + $0xe0] sm:$0xff] %vm156_vm0, %v88_v61 }
 0x106   :  { %v153_v62 = vpop.trf.xlu1  ;;  %v89_v63 = vpop.trf.xlu0 }
 0x107   :  { %218 = vst.msk [vmem:[%s534_s1 + $0x1e8] sm:$0xff] %vm156_vm0, %v153_v62  ;;  %186 = vst.msk [vmem:[%s534_s1 + $0xe8] sm:$0xff] %vm156_vm0, %v89_v63 }
 0x10a   :  { %v154_v0 = vpop.trf.xlu1  ;;  %v90_v1 = vpop.trf.xlu0 }
 0x10b   :  { %219 = vst.msk [vmem:[%s534_s1 + $0x1f0] sm:$0xff] %vm156_vm0, %v154_v0  ;;  %187 = vst.msk [vmem:[%s534_s1 + $0xf0] sm:$0xff] %vm156_vm0, %v90_v1 }
 0x10e   :  { %v155_v2 = vpop.trf.xlu1  ;;  %v91_v3 = vpop.trf.xlu0 }
 0x10f   :  { %220 = vst.msk [vmem:[%s534_s1 + $0x1f8] sm:$0xff] %vm156_vm0, %v155_v2  ;;  %188 = vst.msk [vmem:[%s534_s1 + $0xf8] sm:$0xff] %vm156_vm0, %v91_v3 }
 0x110   :  { %225 = vsyncpa [#allocation3], 1 }

</bundles_post_ra>
